<compile_context>
chip_gen: v7x
topology: tpu7x:2x2x1
jax: 0.10.0
libtpu: 0.0.40
codegen_flags: <defaults>
</compile_context>

<pallas_src>
import functools

import jax
import jax.numpy as jnp
from jax.experimental import pallas as pl
from jax.experimental.pallas import tpu as pltpu

EPS = 1e-5
_LANE = 128
_VMEM_LIMIT_BYTES = 32 * 1024 * 1024     # safe scoped-VMEM limit on v5e/v6e/v7x
_BLOCK_BUDGET_BYTES = 10 * 1024 * 1024   # target bytes for pipelined buffers + temps


def _round_up(a, b):
    return -(-a // b) * b


# --------------------------------------------------------------------------
# Fused kernel: full H*W of each row resident in the block (common case).
# --------------------------------------------------------------------------
def _instance_norm_kernel(x_ref, o_ref, *, inv_hw):
    x = x_ref[...].astype(jnp.float32)
    s = jnp.sum(x, axis=-1, keepdims=True)                # XLU reduce
    sq = jnp.sum(x * x, axis=-1, keepdims=True)
    mean = s * inv_hw
    var = jnp.maximum(sq * inv_hw - mean * mean, 0.0)     # clamp vs cancellation
    rstd = jax.lax.rsqrt(var + EPS)                        # EUP
    o_ref[...] = ((x - mean) * rstd).astype(o_ref.dtype)


# --------------------------------------------------------------------------
# Two-pass kernels for very large H*W (a full row does not fit in VMEM).
# Pass 1: accumulate sum / sumsq over H*W chunks -> per-row mean / rstd.
# Pass 2: re-read x and normalize.
# --------------------------------------------------------------------------
def _stats_kernel(x_ref, mean_ref, rstd_ref, sum_sc, sq_sc, *, hw, inv_hw):
    j = pl.program_id(1)

    @pl.when(j == 0)
    def _():
        sum_sc[...] = jnp.zeros_like(sum_sc)
        sq_sc[...] = jnp.zeros_like(sq_sc)

    x = x_ref[...].astype(jnp.float32)
    rb, hb = x.shape
    # Mask the ragged tail of the last H*W chunk (edge-block padding may be
    # arbitrary); zeros keep sum / sumsq exact.
    col = j * hb + jax.lax.broadcasted_iota(jnp.int32, (rb, hb), 1)
    x = jnp.where(col < hw, x, 0.0)
    sum_sc[...] += jnp.sum(x, axis=-1, keepdims=True)
    sq_sc[...] += jnp.sum(x * x, axis=-1, keepdims=True)

    @pl.when(j == pl.num_programs(1) - 1)
    def _():
        mean = sum_sc[...] * inv_hw
        var = jnp.maximum(sq_sc[...] * inv_hw - mean * mean, 0.0)
        mean_ref[...] = mean
        rstd_ref[...] = jax.lax.rsqrt(var + EPS)


def _apply_kernel(x_ref, mean_ref, rstd_ref, o_ref):
    x = x_ref[...].astype(jnp.float32)
    o_ref[...] = ((x - mean_ref[...]) * rstd_ref[...]).astype(o_ref.dtype)


# --------------------------------------------------------------------------
# Block sizing
# --------------------------------------------------------------------------
def _pick_row_block(rows, hw, itemsize, budget):
    """Largest row count whose pipelined working set fits the VMEM budget.

    Returns None if even `sub` rows do not fit -> caller uses two-pass path.
    The result is either a multiple of 8 or exactly `rows`, so the BlockSpec
    is always legal and never exceeds the array extent.
    """
    sub = 16 if itemsize < 4 else 8                  # sublane packing for 16-bit dtypes
    hw_padded = _round_up(hw, _LANE)                 # VMEM tiles are lane-padded
    # per row while pipelined: input (x2 buffers) + output (x2) native dtype
    # plus ~2 f32 in-kernel temporaries.
    per_row = hw_padded * (4 * itemsize + 8)
    max_rows = (budget // per_row) // sub * sub
    if max_rows < sub:
        return None
    row_block = int(min(max_rows, _round_up(rows, sub), 1024))
    return int(min(row_block, rows))


# --------------------------------------------------------------------------
# Drivers
# --------------------------------------------------------------------------
def _norm_rows_fused(x2, rows, hw, out_dtype, row_block):
    grid = (pl.cdiv(rows, row_block),)               # ragged last block handled by Pallas
    return pl.pallas_call(
        functools.partial(_instance_norm_kernel, inv_hw=1.0 / hw),
        out_shape=jax.ShapeDtypeStruct((rows, hw), out_dtype),
        grid_spec=pltpu.PrefetchScalarGridSpec(
            num_scalar_prefetch=0,
            grid=grid,
            in_specs=[pl.BlockSpec((row_block, hw), lambda i: (i, 0))],
            out_specs=pl.BlockSpec((row_block, hw), lambda i: (i, 0)),
        ),
        compiler_params=pltpu.CompilerParams(
            dimension_semantics=("parallel",),
            vmem_limit_bytes=_VMEM_LIMIT_BYTES,
        ),
    )(x2)


def _norm_rows_two_pass(x2, rows, hw, out_dtype, budget):
    itemsize = jnp.dtype(x2.dtype).itemsize
    sub = 16 if itemsize < 4 else 8
    row_block = int(min(_round_up(rows, sub), 256, rows))
    per_elem = 4 * itemsize + 8
    hw_block = max(_LANE, (budget // (row_block * per_elem)) // _LANE * _LANE)
    hw_block = int(min(hw_block, _round_up(hw, _LANE)))
    n_r = pl.cdiv(rows, row_block)
    n_h = pl.cdiv(hw, hw_block)
    inv_hw = 1.0 / hw

    mean, rstd = pl.pallas_call(
        functools.partial(_stats_kernel, hw=hw, inv_hw=inv_hw),
        out_shape=(jax.ShapeDtypeStruct((rows, 1), jnp.float32),
                   jax.ShapeDtypeStruct((rows, 1), jnp.float32)),
        grid_spec=pltpu.PrefetchScalarGridSpec(
            num_scalar_prefetch=0,
            grid=(n_r, n_h),
            in_specs=[pl.BlockSpec((row_block, hw_block), lambda i, j: (i, j))],
            out_specs=[pl.BlockSpec((row_block, 1), lambda i, j: (i, 0)),
                       pl.BlockSpec((row_block, 1), lambda i, j: (i, 0))],
            scratch_shapes=[pltpu.VMEM((row_block, 1), jnp.float32),
                            pltpu.VMEM((row_block, 1), jnp.float32)],
        ),
        compiler_params=pltpu.CompilerParams(
            dimension_semantics=("parallel", "arbitrary"),
            vmem_limit_bytes=_VMEM_LIMIT_BYTES,
        ),
    )(x2)

    return pl.pallas_call(
        _apply_kernel,
        out_shape=jax.ShapeDtypeStruct((rows, hw), out_dtype),
        grid_spec=pltpu.PrefetchScalarGridSpec(
            num_scalar_prefetch=0,
            grid=(n_r, n_h),
            in_specs=[pl.BlockSpec((row_block, hw_block), lambda i, j: (i, j)),
                      pl.BlockSpec((row_block, 1), lambda i, j: (i, 0)),
                      pl.BlockSpec((row_block, 1), lambda i, j: (i, 0))],
            out_specs=pl.BlockSpec((row_block, hw_block), lambda i, j: (i, j)),
        ),
        compiler_params=pltpu.CompilerParams(
            dimension_semantics=("parallel", "parallel"),
            vmem_limit_bytes=_VMEM_LIMIT_BYTES,
        ),
    )(x2, mean, rstd)


def norm_layer_forward(x, *, block_budget_bytes=_BLOCK_BUDGET_BYTES):
    """Equivalent of norm_layer.forward for NCHW input x."""
    N, C, H, W = x.shape
    # PyTorch: skip normalization if H == 1 or W == 1 (static shape check).
    if H == 1 or W == 1:
        return x
    rows, hw = N * C, H * W
    x2 = x.reshape(rows, hw)                         # contiguous view, free
    itemsize = jnp.dtype(x.dtype).itemsize
    row_block = _pick_row_block(rows, hw, itemsize, block_budget_bytes)
    if row_block is not None:
        out = _norm_rows_fused(x2, rows, hw, x.dtype, row_block)
    else:
        out = _norm_rows_two_pass(x2, rows, hw, x.dtype, block_budget_bytes)
    return out.reshape(N, C, H, W)


def _reference(x):
    # Pure-JAX InstanceNorm2d reference (affine=False, eps=1e-5), f32 math.
    xf = x.astype(jnp.float32)
    mean = jnp.mean(xf, axis=(2, 3), keepdims=True)
    var = jnp.mean((xf - mean) ** 2, axis=(2, 3), keepdims=True)
    return (xf - mean) / jnp.sqrt(var + EPS)


if __name__ == "__main__":
    root = jax.random.PRNGKey(0)
    k0, k1, k2, k3, k4 = jax.random.split(root, 5)

    # 1) Main fused path, lane-aligned H*W.
    x = jax.random.normal(k0, (2, 4, 16, 16), dtype=jnp.float32)
    y = jax.block_until_ready(norm_layer_forward(x))
    assert y.shape == x.shape and y.dtype == x.dtype
    assert jnp.max(jnp.abs(y - _reference(x))) < 1e-4

    # 2) Non-128-multiple spatial (14x14) and ragged row count (N*C = 3).
    xb = jax.random.normal(k1, (1, 3, 14, 14), dtype=jnp.float32)
    yb = jax.block_until_ready(norm_layer_forward(xb))
    assert jnp.max(jnp.abs(yb - _reference(xb))) < 1e-4

    # 3) Two-pass (chunked H*W) path, forced with a tiny block budget.
    xc = jax.random.normal(k2, (2, 3, 24, 40), dtype=jnp.float32)
    yc = jax.block_until_ready(norm_layer_forward(xc, block_budget_bytes=64 * 1024))
    assert jnp.max(jnp.abs(yc - _reference(xc))) < 1e-4

    # 4) bf16 path (16-bit sublane packing, f32 accumulation in-kernel).
    xd = jax.random.normal(k3, (2, 4, 16, 16), dtype=jnp.bfloat16)
    yd = jax.block_until_ready(norm_layer_forward(xd))
    assert yd.dtype == jnp.bfloat16
    assert jnp.max(jnp.abs(yd.astype(jnp.float32) - _reference(xd))) < 5e-2

    # 5) Pass-through branch (H == 1).
    x1 = jax.random.normal(k4, (2, 4, 1, 16), dtype=jnp.float32)
    y1 = jax.block_until_ready(norm_layer_forward(x1))
    assert jnp.array_equal(y1, x1)

    print("KERNEL_OK")
</pallas_src>

<mosaic_0001>
module attributes {stable_mosaic.version = 11 : i64} {
  func.func @_instance_norm_kernel(%arg0: i32, %arg1: memref<8x256xf32, #tpu.memory_space<vmem>>, %arg2: memref<8x256xf32, #tpu.memory_space<vmem>>) attributes {dimension_semantics = [#tpu.dimension_semantics<parallel>], iteration_bounds = array<i64: 1>, scalar_prefetch = 0 : i64, scratch_operands = 0 : i64, tpu.core_type = #tpu.core_type<tc>, window_params = [{transform_indices = @transform_0, window_bounds = array<i64: 8, 256>}, {transform_indices = @transform_1, window_bounds = array<i64: 8, 256>}]} {
    %c0 = arith.constant 0 : index
    %c0_0 = arith.constant 0 : index
    %0 = vector.load %arg1[%c0, %c0_0] : memref<8x256xf32, #tpu.memory_space<vmem>>, vector<8x256xf32>
    %cst = arith.constant dense<0.000000e+00> : vector<8xf32>
    %1 = vector.multi_reduction <add>, %0, %cst [1] : vector<8x256xf32> to vector<8xf32>
    %2 = vector.shape_cast %1 : vector<8xf32> to vector<8x1xf32>
    %3 = arith.mulf %0, %0 : vector<8x256xf32>
    %cst_1 = arith.constant dense<0.000000e+00> : vector<8xf32>
    %4 = vector.multi_reduction <add>, %3, %cst_1 [1] : vector<8x256xf32> to vector<8xf32>
    %5 = vector.shape_cast %4 : vector<8xf32> to vector<8x1xf32>
    %cst_2 = arith.constant 3.906250e-03 : f32
    %6 = vector.broadcast %cst_2 : f32 to vector<8x1xf32>
    %7 = arith.mulf %2, %6 : vector<8x1xf32>
    %cst_3 = arith.constant 3.906250e-03 : f32
    %8 = vector.broadcast %cst_3 : f32 to vector<8x1xf32>
    %9 = arith.mulf %5, %8 : vector<8x1xf32>
    %10 = arith.mulf %7, %7 : vector<8x1xf32>
    %11 = arith.subf %9, %10 : vector<8x1xf32>
    %cst_4 = arith.constant 0.000000e+00 : f32
    %12 = vector.broadcast %cst_4 : f32 to vector<8x1xf32>
    %13 = arith.maximumf %11, %12 : vector<8x1xf32>
    %cst_5 = arith.constant 9.99999974E-6 : f32
    %14 = vector.broadcast %cst_5 : f32 to vector<8x1xf32>
    %15 = arith.addf %13, %14 : vector<8x1xf32>
    %16 = math.rsqrt %15 : vector<8x1xf32>
    %17 = vector.broadcast %7 : vector<8x1xf32> to vector<8x256xf32>
    %18 = arith.subf %0, %17 : vector<8x256xf32>
    %19 = vector.broadcast %16 : vector<8x1xf32> to vector<8x256xf32>
    %20 = arith.mulf %18, %19 : vector<8x256xf32>
    %c0_6 = arith.constant 0 : index
    %c0_7 = arith.constant 0 : index
    %21 = vector.load %arg2[%c0_6, %c0_7] : memref<8x256xf32, #tpu.memory_space<vmem>>, vector<8x256xf32>
    tpu.vector_store %arg2[%c0_6, %c0_7], %20 {strides = array<i32>} : memref<8x256xf32, #tpu.memory_space<vmem>>, vector<8x256xf32>,
    return
  }
  func.func @transform_0(%arg0: i32) -> (i32, i32) {
    %c0_i32 = arith.constant 0 : i32
    %c0_i32_0 = arith.constant 0 : i32
    return %arg0, %c0_i32 : i32, i32
  }
  func.func @transform_1(%arg0: i32) -> (i32, i32) {
    %c0_i32 = arith.constant 0 : i32
    %c0_i32_0 = arith.constant 0 : i32
    return %arg0, %c0_i32 : i32, i32
  }
}

</mosaic_0001>

<bundles_post_ra>
// kernel: tpu_custom_call.1
= control target key start
LH: loop header
LB: loop body
LE: loop exit
PB: predicated region body
PF: predicated region fallthrough
CT: control target
= control target key end

     0   :  { %6 = vsyncpa [#allocation3], 0  ;;  %s147_s0 = inlined_call_operand.hbm [shape: f32[8,256], index: 0, kind: input, shape index: {}]   ;;  %s148_s1 = inlined_call_operand.hbm [shape: f32[8,256], index: 1, kind: output, shape index: {}]  }
   0x1   :  { %7 = vsyncpa [#allocation4], 0  ;;  %s111_s6 = smov [#allocation2]   ;;  %s63_s10 = scalar_lea.hbm %s147_s0, 256 }
   0x2   :  { %s14_s7 = sshll.u32 %s111_s6, 4  ;;  %p64_p0 = scmp.ne.s32.totalorder %s147_s0, %s63_s10  ;;  %s15_s7 = int_to_ptr.vmem [resolvable:$true] %s14_s7 }
   0x3   :  { %p67_p1 = scmp.lt.u32.totalorder %s63_s10, %s147_s0 }
   0x5   :  { %p69_p2 = pnand %p67_p1, %p64_p0 }
   0x7   :  { %72 = shalt.err (!%p69_p2)
}
   0x8   :  { %s73_s15 = scalar_lea.vmem %s15_s7, 256  ;;  %p78_p4 = scmp.lt.s32.totalorder %s15_s7, %s15_s7 }
   0x9   :  { %p74_p3 = scmp.ne.s32.totalorder %s15_s7, %s73_s15  ;;  %p79_p5 = scmp.lt.s32.totalorder %s73_s15, %s73_s15 }
   0xb   :  { %p80_p6 = por %p79_p5, %p78_p4 }
   0xd   :  { %p81_p7 = pnand %p80_p6, %p74_p3 }
   0xf   :  { %84 = shalt.err (!%p81_p7)
}
  0x10   :  { %17 = dma.hbm_to_vmem [thread:$0]  %s147_s0, 256, %s15_s7, [#allocation3]  }
  0x11   :  { %107 = dma.done.wait [#allocation3], 256  }
  0x12   :  { %108 = vsyncadd [#allocation3], 4294967040  ;;  %v21_v0 = vld [vmem:[#allocation2] sm:$0xff]  ;;  %v22_v1 = vld [vmem:[#allocation2 + $0x8] sm:$0xff]  ;;  %s112_s0 = smov [#allocation5]  }
  0x13   :  { %v23_v2 = vadd.f32 %v22_v1, %v21_v0  ;;  %v26_v3 = vmul.f32 %v21_v0, %v21_v0  ;;  %v27_v4 = vmul.f32 %v22_v1, %v22_v1  ;;  %s50_s18 = sshll.u32 %s112_s0, 4  ;;  %s51_s18 = int_to_ptr.vmem [resolvable:$true] %s50_s18 }
  0x14   :  { %s85_s19 = scalar_lea.vmem %s51_s18, 256  ;;  %p90_p9 = scmp.lt.s32.totalorder %s51_s18, %s51_s18 }
  0x15   :  { %24 = vadd.xlane.f32.xlu0 %v23_v2  ;;  %v28_v5 = vadd.f32 %v27_v4, %v26_v3  ;;  %p86_p8 = scmp.ne.s32.totalorder %s51_s18, %s85_s19  ;;  %p91_p10 = scmp.lt.s32.totalorder %s85_s19, %s85_s19 }
  0x17   :  { %p92_p11 = por %p91_p10, %p90_p9 }
  0x19   :  { %29 = vadd.xlane.f32.xlu0 %v28_v5  ;;  %p93_p12 = pnand %p92_p11, %p86_p8 }
  0xa2   :  { %v25_v6 = vpop.xlane.xlu0 %24 }
  0xa3   :  { %v31_v7 = vmul.f32 0.00390625, %v25_v6 }
  0xa5   :  { %v33_v9 = vmul.f32 %v31_v7, %v31_v7  ;;  %v38_v14 = vsub.f32 %v21_v0, %v31_v7  ;;  %v39_v15 = vsub.f32 %v22_v1, %v31_v7 }
  0xa6   :  { %v30_v8 = vpop.xlane.xlu0 %29 }
  0xa7   :  { %v32_v10 = vmul.f32 0.00390625, %v30_v8 }
  0xa9   :  { %v34_v11 = vsub.f32 %v32_v10, %v33_v9 }
  0xab   :  { %v35_v12 = vmax.f32 %v34_v11, 0.0 }
  0xad   :  { %v36_v13 = vadd.f32 1e-05, %v35_v12 }
  0xaf   :  { %61 = vrsqrt.f32 %v36_v13 }
  0xb9   :  { %v62_v16 = vpop.eup %61 }
  0xba   :  { %v40_v17 = vmul.f32 %v62_v16, %v38_v14  ;;  %v41_v18 = vmul.f32 %v62_v16, %v39_v15 }
  0xbc   :  { %42 = vst [vmem:[#allocation5] sm:$0xff] %v40_v17  ;;  %43 = vst [vmem:[#allocation5 + $0x8] sm:$0xff] %v41_v18 }
  0xbd   :  { %96 = shalt.err (!%p93_p12)
}
  0xbe   :  { %s97_s22 = scalar_lea.hbm %s148_s1, 256 }
  0xbf   :  { %p98_p13 = scmp.ne.s32.totalorder %s148_s1, %s97_s22  ;;  %p101_p0 = scmp.lt.u32.totalorder %s97_s22, %s148_s1 }
  0xc1   :  { %p103_p1 = pnand %p101_p0, %p98_p13 }
  0xc3   :  { %106 = shalt.err (!%p103_p1)
}
  0xc4   :  { %53 = dma.vmem_to_hbm [thread:$0]  %s51_s18, 256, %s148_s1, [#allocation4]  }
  0xc5   :  { %109 = dma.done.wait [#allocation4], 256  }
  0xc6   :  { %110 = vsyncadd [#allocation4], 4294967040 }
  0xc7   :  { %57 = vsyncpa [#allocation3], 1 }
  0xc8   :  { %58 = vsyncpa [#allocation4], 1 }

</bundles_post_ra>
